<compile_context>
chip_gen: v5e
topology: v5e:2x2
jax: 0.10.0
libtpu: 0.0.40
codegen_flags: <defaults>
</compile_context>

<pallas_src>
import jax
import jax.numpy as jnp
from jax.experimental import pallas as pl
from jax.experimental.pallas import tpu as pltpu


def _dma_copy_kernel(x_ref, o_ref, sem):
    # One direct HBM->HBM DMA of the full array: no VMEM staging, no (8,128)
    # tiling constraints, no vreg traffic.  A single contiguous DMA already
    # saturates the copy roofline, so no chunking / extra buffering is added.
    cp = pltpu.make_async_copy(x_ref, o_ref, sem)
    cp.start()
    cp.wait()


def _pallas_identity_copy(x: jax.Array) -> jax.Array:
    """Materialize a distinct copy of `x` via a direct HBM->HBM DMA."""
    if x.size == 0:
        return jnp.copy(x)
    return pl.pallas_call(
        _dma_copy_kernel,
        out_shape=jax.ShapeDtypeStruct(x.shape, x.dtype),
        in_specs=[pl.BlockSpec(memory_space=pl.ANY)],
        out_specs=pl.BlockSpec(memory_space=pl.ANY),
        scratch_shapes=[pltpu.SemaphoreType.DMA],
        compiler_params=pltpu.CompilerParams(has_side_effects=True),
    )(x)


def notrans_forward(input_embd: jax.Array, *, materialize_copy: bool = False) -> jax.Array:
    """Pallas TPU implementation of notrans.forward (identity).

    Default (fast) path: identity needs no kernel and no HBM traffic -- return the
    input unchanged.  Set `materialize_copy=True` only if a distinct output buffer is
    contractually required; that path runs the direct HBM->HBM DMA copy kernel.
    """
    if not materialize_copy:
        return input_embd
    return _pallas_identity_copy(input_embd)


if __name__ == "__main__":
    key = jax.random.PRNGKey(0)
    # Small embedding-shaped input consistent with `input_embd`:
    # batch=2, seq=8, hidden=32
    x = jax.random.normal(key, (2, 8, 32), dtype=jnp.float32)

    # Optimal path: pure identity, no kernel launched.
    y_fast = notrans_forward(x)
    jax.block_until_ready(y_fast)
    assert y_fast.shape == x.shape and y_fast.dtype == x.dtype
    assert bool(jnp.all(y_fast == x))

    # Materialized-copy Pallas DMA kernel (bit-exact copy).
    y_copy = notrans_forward(x, materialize_copy=True)
    jax.block_until_ready(y_copy)
    assert y_copy.shape == x.shape and y_copy.dtype == x.dtype
    assert bool(jnp.all(y_copy == x))

    # Irregular shape (element count not a multiple of 128): handled by the same
    # shape-agnostic DMA path -- no special-case fallback, no VMEM blow-up.
    x_odd = jax.random.normal(jax.random.PRNGKey(1), (3, 5, 7), dtype=jnp.bfloat16)
    y_odd = notrans_forward(x_odd, materialize_copy=True)
    jax.block_until_ready(y_odd)
    assert y_odd.shape == x_odd.shape and y_odd.dtype == x_odd.dtype
    assert bool(jnp.all(y_odd == x_odd))

    print("KERNEL_OK")
</pallas_src>

<mosaic_0001>
module attributes {stable_mosaic.version = 11 : i64} {
  func.func @_dma_copy_kernel(%arg0: memref<2x8x32xf32, #tpu.memory_space<any>>, %arg1: memref<2x8x32xf32, #tpu.memory_space<any>>, %arg2: memref<!tpu.dma_semaphore, #tpu.memory_space<semaphore_mem>>) attributes {dimension_semantics = [], scalar_prefetch = 0 : i64, scratch_operands = 1 : i64, tpu.core_type = #tpu.core_type<tc>} {
    tpu.enqueue_dma source(%arg0 : memref<2x8x32xf32, #tpu.memory_space<any>>) target(%arg1 : memref<2x8x32xf32, #tpu.memory_space<any>>) target_semaphore(%arg2 : memref<!tpu.dma_semaphore, #tpu.memory_space<semaphore_mem>>)
    tpu.wait_dma2 semaphore(%arg2 : memref<!tpu.dma_semaphore, #tpu.memory_space<semaphore_mem>>) src(%arg0 : memref<2x8x32xf32, #tpu.memory_space<any>>) dst(%arg1 : memref<2x8x32xf32, #tpu.memory_space<any>>)
    return
  }
}

</mosaic_0001>

<bundles_post_ra>
// kernel: tpu_custom_call.1
= control target key start
LH: loop header
LB: loop body
LE: loop exit
PB: predicated region body
PF: predicated region fallthrough
CT: control target
= control target key end

     0   :  { %s33_s12 = smov [#allocation2]   ;;  %s34_s13 = smov [#allocation3]   ;;  %s52_s0 = inlined_call_operand.hbm [shape: f32[2,8,32], index: 0, kind: input, shape index: {}]   ;;  %s53_s1 = inlined_call_operand.hbm [shape: f32[2,8,32], index: 1, kind: output, shape index: {}]  }
   0x1   :  { %s10_s8 = sshll.u32 %s52_s0, 4  ;;  %s12_s11 = sshll.u32 %s53_s1, 4  ;;  %s11_s8 = int_to_ptr.hbm [resolvable:$true] %s10_s8  ;;  %s13_s11 = int_to_ptr.hbm [resolvable:$true] %s12_s11 }
   0x2   :  { %s35_s14 = smov 0  }
   0x3   :  { %16 = dma.general %s11_s8, 256, %s13_s11, %s33_s12, %s34_s13, [#allocation4], %s35_s14, 0  }
   0x4   :  { %31 = dma.done.wait [#allocation2], 256 }
   0x5   :  { %32 = vsyncadd [#allocation2], 4294967040 }
   0x6   :  { %21 = vsyncmov [#allocation2] }
   0x9   :  { %s22_s15 = vpop.sfrf %21 }
   0xa   :  { %p27_p0 = scmp.ne.s32.totalorder %s22_s15, 0 }
   0xc   :  { %26 = shalt.err (%p27_p0)  }

</bundles_post_ra>
